<compile_context>
chip_gen: v7x
topology: tpu7x:2x2x1
jax: 0.10.0
libtpu: 0.0.40
codegen_flags: <defaults>
</compile_context>

<pallas_src>
import jax
import jax.numpy as jnp
from jax.experimental import pallas as pl
from jax.experimental.pallas import tpu as pltpu


def _round_up(x, m):
    return ((x + m - 1) // m) * m


def _classhead_kernel(x_ref, w_ref, b_ref, o_ref):
    # x_ref: (C, t_hw)  activation tile, NCHW order (spatial on lanes)
    # w_ref: (O, C)     full 1x1-conv weight, VMEM-resident across the grid
    # b_ref: (O, 1)     bias column (f32)
    # o_ref: (O, t_hw)  lane-dense output tile
    acc = jnp.dot(w_ref[...], x_ref[...],
                  preferred_element_type=jnp.float32)        # (O, t_hw) f32
    o_ref[...] = (acc + b_ref[...]).astype(o_ref.dtype)


def class_head_forward(x_nchw, weight, bias, num_anchors=3, *,
                       t_hw=None, target_tile_bytes=1 << 20,
                       compute_dtype=None):
    """x_nchw: (N, C, H, W); weight: (O, C, 1, 1); bias: (O,).

    Returns (N, H*W*num_anchors, 2), matching
    conv1x1(x).permute(0, 2, 3, 1).reshape(N, -1, 2).
    """
    N, C, H, W = x_nchw.shape
    O = weight.shape[0]
    assert O == num_anchors * 2
    HW = H * W
    out_dtype = x_nchw.dtype

    cdt = jnp.dtype(compute_dtype) if compute_dtype is not None else jnp.dtype(out_dtype)
    dtype_bytes = cdt.itemsize

    # Lane tile: ~target_tile_bytes per input buffer, multiple of 128.
    if t_hw is None:
        t_hw = max(128, (target_tile_bytes // (C * dtype_bytes)) // 128 * 128)
    t_hw = _round_up(t_hw, 128)
    # Never larger than needed for this map; if N == 1, force >= 2 HW steps so
    # both v7x TensorCores get work.
    min_steps = 2 if N == 1 else 1
    t_hw = min(t_hw, _round_up(pl.cdiv(HW, min_steps), 128))

    x3 = x_nchw.reshape(N, C, HW).astype(cdt)    # free reshape; cast is no-op if same dtype
    w_mat = weight.reshape(O, C).astype(cdt)     # (O, C)
    b_col = bias.reshape(O, 1).astype(jnp.float32)

    grid = (N, pl.cdiv(HW, t_hw))                # both axes independent ("parallel")

    cost = pl.CostEstimate(
        flops=2 * N * C * HW * O,
        transcendentals=0,
        bytes_accessed=(N * C * HW * dtype_bytes          # activation read
                        + O * C * dtype_bytes             # weight
                        + O * 4                            # bias
                        + N * O * HW * jnp.dtype(out_dtype).itemsize),  # output write
    )

    out = pl.pallas_call(
        _classhead_kernel,
        out_shape=jax.ShapeDtypeStruct((N, O, HW), out_dtype),
        grid=grid,
        in_specs=[
            pl.BlockSpec((pl.Squeezed(), C, t_hw), lambda n, j: (n, 0, j)),  # activation tile
            pl.BlockSpec((O, C), lambda n, j: (0, 0)),                        # weight, resident
            pl.BlockSpec((O, 1), lambda n, j: (0, 0)),                        # bias, resident
        ],
        out_specs=pl.BlockSpec((pl.Squeezed(), O, t_hw), lambda n, j: (n, 0, j)),
        compiler_params=pltpu.CompilerParams(
            dimension_semantics=("parallel", "parallel"),
            vmem_limit_bytes=32 * 1024 * 1024,
        ),
        cost_estimate=cost,
    )(x3, w_mat, b_col)

    # (N, O, HW) -> (N, HW, O): cheap transpose touching only O=6 channels;
    # matches permute(0, 2, 3, 1) since HW is H,W-major and O is channels-last.
    out = jnp.transpose(out, (0, 2, 1))
    return out.reshape(N, HW * num_anchors, 2)


def _reference(x, weight, bias, num_anchors, compute_dtype=None):
    N, C, H, W = x.shape
    O = weight.shape[0]
    cdt = jnp.dtype(compute_dtype) if compute_dtype is not None else x.dtype
    xf = x.astype(cdt).astype(jnp.float32)
    wf = weight.reshape(O, C).astype(cdt).astype(jnp.float32)
    ref = jnp.einsum("nchw,oc->nhwo", xf, wf) + bias.astype(jnp.float32)
    return ref.astype(x.dtype).reshape(N, H * W * num_anchors, 2)


if __name__ == "__main__":
    key = jax.random.PRNGKey(0)
    kx, kw, kb, kx2 = jax.random.split(key, 4)

    num_anchors = 3
    O = num_anchors * 2

    # Case 1: aligned feature map (HW multiple of 128), f32.
    N, C, H, W = 2, 32, 16, 16
    x = jax.random.normal(kx, (N, C, H, W), dtype=jnp.float32)
    weight = jax.random.normal(kw, (O, C, 1, 1), dtype=jnp.float32) * 0.05
    bias = jax.random.normal(kb, (O,), dtype=jnp.float32) * 0.05

    out = jax.block_until_ready(class_head_forward(x, weight, bias, num_anchors))
    ref = _reference(x, weight, bias, num_anchors)
    assert out.shape == (N, H * W * num_anchors, 2), out.shape
    assert jnp.allclose(out, ref, atol=1e-4, rtol=1e-4), "mismatch vs reference (case 1)"

    # Case 2: ragged spatial size (H*W = 143, not a multiple of 128) -> partial
    # last tile handled by Pallas, no wrapper pad / slice.
    H2, W2 = 13, 11
    x2 = jax.random.normal(kx2, (N, C, H2, W2), dtype=jnp.float32)
    out2 = jax.block_until_ready(class_head_forward(x2, weight, bias, num_anchors))
    ref2 = _reference(x2, weight, bias, num_anchors)
    assert out2.shape == (N, H2 * W2 * num_anchors, 2), out2.shape
    assert jnp.allclose(out2, ref2, atol=1e-4, rtol=1e-4), "mismatch vs reference (case 2)"

    # Case 3: single-image path -> HW axis split into >= 2 grid steps (v7x TCs).
    x1 = x[:1]
    out3 = jax.block_until_ready(class_head_forward(x1, weight, bias, num_anchors))
    ref3 = _reference(x1, weight, bias, num_anchors)
    assert out3.shape == (1, H * W * num_anchors, 2), out3.shape
    assert jnp.allclose(out3, ref3, atol=1e-4, rtol=1e-4), "mismatch vs reference (case 3)"

    # Case 4: bf16 compute path (halves activation HBM bytes; f32 MXU accumulate).
    out4 = jax.block_until_ready(
        class_head_forward(x, weight, bias, num_anchors, compute_dtype=jnp.bfloat16))
    ref4 = _reference(x, weight, bias, num_anchors, compute_dtype=jnp.bfloat16)
    assert out4.shape == (N, H * W * num_anchors, 2), out4.shape
    assert jnp.allclose(out4, ref4, atol=1e-2, rtol=1e-2), "mismatch vs reference (case 4)"

    print("KERNEL_OK")
</pallas_src>

<mosaic_0001>
module attributes {stable_mosaic.version = 11 : i64} {
  func.func @_classhead_kernel(%arg0: i32, %arg1: i32, %arg2: memref<1x32x256xf32, #tpu.memory_space<vmem>>, %arg3: memref<6x32xf32, #tpu.memory_space<vmem>>, %arg4: memref<6x1xf32, #tpu.memory_space<vmem>>, %arg5: memref<1x6x256xf32, #tpu.memory_space<vmem>>) attributes {dimension_semantics = [#tpu.dimension_semantics<parallel>, #tpu.dimension_semantics<parallel>], iteration_bounds = array<i64: 2, 1>, scalar_prefetch = 0 : i64, scratch_operands = 0 : i64, tpu.core_type = #tpu.core_type<tc>, window_params = [{transform_indices = @transform_0, window_bounds = array<i64: 1, 32, 256>}, {pipeline_mode = #tpu.pipeline_mode<synchronous>, transform_indices = @transform_1, window_bounds = array<i64: 6, 32>}, {pipeline_mode = #tpu.pipeline_mode<synchronous>, transform_indices = @transform_2, window_bounds = array<i64: 6, 1>}, {transform_indices = @transform_3, window_bounds = array<i64: 1, 6, 256>}]} {
    %c0 = arith.constant 0 : index
    %c0_0 = arith.constant 0 : index
    %0 = vector.load %arg3[%c0, %c0_0] : memref<6x32xf32, #tpu.memory_space<vmem>>, vector<6x32xf32>
    %c0_1 = arith.constant 0 : index
    %c0_2 = arith.constant 0 : index
    %c0_3 = arith.constant 0 : index
    %1 = vector.load %arg2[%c0_1, %c0_2, %c0_3] : memref<1x32x256xf32, #tpu.memory_space<vmem>>, vector<1x32x256xf32>
    %2 = vector.shape_cast %1 : vector<1x32x256xf32> to vector<32x256xf32>
    %cst = arith.constant dense<0.000000e+00> : vector<6x256xf32>
    %3 = tpu.matmul %0, %2, %cst {dimension_numbers = #tpu.dot_dimension_numbers<[1], [0], [0], [1], [0, 0, 1, 1], [], []>} : vector<6x32xf32>, vector<32x256xf32>, vector<6x256xf32> -> vector<6x256xf32>
    %c0_4 = arith.constant 0 : index
    %c0_5 = arith.constant 0 : index
    %4 = vector.load %arg4[%c0_4, %c0_5] : memref<6x1xf32, #tpu.memory_space<vmem>>, vector<6x1xf32>
    %5 = vector.broadcast %4 : vector<6x1xf32> to vector<6x256xf32>
    %6 = arith.addf %3, %5 : vector<6x256xf32>
    %c0_6 = arith.constant 0 : index
    %c0_7 = arith.constant 0 : index
    %c0_8 = arith.constant 0 : index
    %7 = vector.load %arg5[%c0_6, %c0_7, %c0_8] : memref<1x6x256xf32, #tpu.memory_space<vmem>>, vector<1x6x256xf32>
    %8 = vector.shape_cast %7 : vector<1x6x256xf32> to vector<6x256xf32>
    %9 = vector.shape_cast %6 : vector<6x256xf32> to vector<1x6x256xf32>
    tpu.vector_store %arg5[%c0_6, %c0_7, %c0_8], %9 {strides = array<i32>} : memref<1x6x256xf32, #tpu.memory_space<vmem>>, vector<1x6x256xf32>,
    return
  }
  func.func @transform_0(%arg0: i32, %arg1: i32) -> (i32, i32, i32) {
    %c0_i32 = arith.constant 0 : i32
    %c0_i32_0 = arith.constant 0 : i32
    return %arg0, %c0_i32, %arg1 : i32, i32, i32
  }
  func.func @transform_1(%arg0: i32, %arg1: i32) -> (i32, i32) {
    %c0_i32 = arith.constant 0 : i32
    %c0_i32_0 = arith.constant 0 : i32
    %c0_i32_1 = arith.constant 0 : i32
    return %c0_i32, %c0_i32_0 : i32, i32
  }
  func.func @transform_2(%arg0: i32, %arg1: i32) -> (i32, i32) {
    %c0_i32 = arith.constant 0 : i32
    %c0_i32_0 = arith.constant 0 : i32
    %c0_i32_1 = arith.constant 0 : i32
    return %c0_i32, %c0_i32_0 : i32, i32
  }
  func.func @transform_3(%arg0: i32, %arg1: i32) -> (i32, i32, i32) {
    %c0_i32 = arith.constant 0 : i32
    %c0_i32_0 = arith.constant 0 : i32
    return %arg0, %c0_i32, %arg1 : i32, i32, i32
  }
}

</mosaic_0001>

<bundles_post_ra>
// kernel: tpu_custom_call.1
= control target key start
LH: loop header
LB: loop body
LE: loop exit
PB: predicated region body
PF: predicated region fallthrough
CT: control target
= control target key end

     0   :  { %8 = vsyncpa [#allocation3], 0  ;;  %s727_s0 = inlined_call_operand.hbm [shape: f32[2,32,256], index: 0, kind: input, shape index: {}]   ;;  %s728_s1 = inlined_call_operand.vmem [shape: f32[6,32], index: 1, kind: input, shape index: {}]   ;;  %s729_s2 = inlined_call_operand.vmem [shape: f32[6,1], index: 2, kind: input, shape index: {}]   ;;  %s730_s3 = inlined_call_operand.vmem [shape: f32[2,6,256], index: 3, kind: output, shape index: {}]  }
   0x1   :  { %10 = vsyncpa [#allocation3 + $0x1], 0  ;;  %s597_s12 = smov 0   ;;  %s599_s13 = smov 0  }
   0x2   :  { %s601_s14 = smov 0   ;;  %s603_s15 = smov 0  }
   0x3   :  { %s605_s16 = smov 0   ;;  %s607_s17 = smov 0  }
   0x4 LB: > { %s406_s18 = sadd.s32 4294967295, %s570_s17   ;;  %s28_s19 = sadd.s32 1, %s566_s16  ;;  %s570_s17 = sphi %s607_s17, %s16_s17   ;;  %s566_s16 = sphi %s605_s16, %s738_s16   ;;  %s562_s15 = sphi %s603_s15, %s737_s15   ;;  %s558_s14 = sphi %s601_s14, %s736_s14   ;;  %s554_s13 = sphi %s599_s13, %s735_s13   ;;  %s550_s12 = sphi %s597_s12, %s734_s12  }
   0x5   : > { %p30_p0 = scmp.ge.s32.totalorder %s28_s19, 2  ;;  %s37_s20 = sadd.s32 1, %s558_s14 }
   0x6   : > { %p44_p1 = scmp.ne.s32.totalorder %s558_s14, %s554_s13  ;;  %p45_p2 = scmp.eq.s32.totalorder %s570_s17, 0 }
   0x7   : > { %s740_s19 = smov (%p30_p0, %s28_s19), 0  ;;  %p50_p4 = scmp.ne.s32.totalorder %s554_s13, %s550_s12 }
   0x8   : > { %p633_p3 = por %p45_p2, %p44_p1  ;;  %s32_s22 = ssub.s32 %s566_s16, %s740_s19 }
   0x9   : > { %p51_p5 = scmp.eq.s32.totalorder %s406_s18, 0  ;;  %p35_p6 = scmp.eq.s32.totalorder %s32_s22, 0 }
   0xa   : > { %p436_p8 = scmp.lt.s32.totalorder %s570_s17, 2  ;;  %s150_s25 = sand.u32 1, %s558_s14  }
   0xb   : > { %p640_p7 = por %p51_p5, %p50_p4  ;;  %s420_s26 = sshll.u32 %s566_s16, 10 }
   0xc   : > { %s646_s24 = scalar_select %p35_p6, %s558_s14, %s37_s20  }
   0xd   : > { %s410_s27 = sshll.u32 %s150_s25, 6  ;;  %s653_s30 = scalar_lea.hbm %s727_s0, %s420_s26 }
   0xe   : > { %s154_s4 = scalar_lea.vmem [#allocation2], %s410_s27  ;;  %p657_p9 = pnand %p436_p8, %p633_p3 }
   0xf   : > { %s163_s5 = sshll.u32 %s154_s4, 4  ;;  %s663_s7 = scalar_lea.sflag [#allocation3], %s150_s25  ;;  %s661_s5 = int_to_ptr.vmem [resolvable:$true] %s163_s5 }
  0x10   : > { %s490_s8 = scalar_lea.hbm %s653_s30, 1024  ;;  %p492_p11 = pneg %p657_p9 }
  0x11   : > { %p491_p10 = scmp.ne.s32.totalorder %s653_s30, %s490_s8  ;;  %s495_s11 = scalar_lea.hbm %s727_s0, 2048 }
  0x12   : > { %p496_p0 = scmp.lt.u32.totalorder %s653_s30, %s727_s0  ;;  %p497_p1 = scmp.lt.u32.totalorder %s495_s11, %s490_s8 }
  0x13   : > { %p493_p12 = pnand %p492_p11, %p491_p10  ;;  %p499_p3 = scmp.lt.u32.totalorder %s490_s8, %s653_s30 }
  0x14   : > { %p498_p2 = por %p497_p1, %p496_p0 }
  0x15   : > { %p494_p13 = pneg %p493_p12 }
  0x16   : > { %p500_p4 = por %p499_p3, %p498_p2 }
  0x18   : > { %p501_p5 = pnand %p500_p4, %p494_p13 }
  0x1a   : > { %504 = shalt.err (!%p501_p5)
}
  0x1b   : > { %s505_s20 = scalar_lea.vmem %s661_s5, 1024  ;;  %s572_s21 = smov [#allocation2]  }
  0x1c   : > { %p506_p6 = scmp.ne.s32.totalorder %s661_s5, %s505_s20  ;;  %s510_s22 = sshll.u32 %s572_s21, 4  ;;  %s511_s22 = int_to_ptr.vmem [resolvable:$false] %s510_s22 }
  0x1d   : > { %s512_s25 = scalar_lea.vmem %s511_s22, 2048  ;;  %p513_p12 = scmp.lt.s32.totalorder %s661_s5, %s511_s22 }
  0x1e   : > { %p508_p8 = pnand %p506_p6, %p492_p11  ;;  %p514_p0 = scmp.lt.s32.totalorder %s512_s25, %s505_s20 }
  0x20   : > { %p509_p10 = pneg %p508_p8  ;;  %p515_p1 = por %p514_p0, %p513_p12 }
  0x22   : > { %p516_p2 = pnand %p515_p1, %p509_p10 }
  0x24   : > { %519 = shalt.err (!%p516_p2)
}
  0x25   : > { %s573_s26 = smov 256   ;;  %s574_s27 = smov 16  }
  0x26   : > { %435 = dma.hbm_to_vmem [thread:$0]  (!%p657_p9), %s653_s30, 1024, %s661_s5, %s663_s7, %s573_s26, %s573_s26, %s574_s27  }
  0x27   : > { %p413_p11 = scmp.ge.s32.totalorder %s570_s17, 1  ;;  %p171_p13 = scmp.lt.s32.totalorder %s570_s17, 3 }
  0x29   : > { %p172_p3 = pnand %p413_p11, %p171_p13 }
  0x2a   : > { %s177_s28 = sand.u32 (!%p172_p3), 1, %s554_s13  }
  0x2b   : > { %175 = sbr.rel (%p172_p3) target bundleno = 278 (0x116), region = 32  ;;  %s414_s29 = sshll.u32 (!%p172_p3), %s177_s28, 6 }
  0x2c   : > { %s178_s4 = scalar_lea.sflag (!%p172_p3), [#allocation3], %s177_s28  ;;  %s181_s8 = scalar_lea.vmem (!%p172_p3), [#allocation2], %s414_s29 }
  0x32   : > { %545 = dma.done.wait (%p640_p7), %s178_s4, 1024  }
  0x33   : > { %547 = vsyncadd (%p640_p7), %s178_s4, 4294966272  ;;  %v575_v0 = vmov 0.0   ;;  %v576_v1 = vmov 0   ;;  %v221_v2 = vld [vmem:[%s181_s8 + $0x8] sm:$0xff]  ;;  %v223_v3 = vld [vmem:[%s181_s8 + $0x18] sm:$0xff]  ;;  %vm234_vm0 = vcmask 261120  }
  0x34   : > { %302 = vmatprep.mubr.f32.mxu0 %v575_v0  ;;  %489 = vset.pattern.permute.xlu0 %v576_v1  ;;  %v220_v4 = vld [vmem:[%s181_s8] sm:$0xff]  ;;  %v422_v5 = vpack.c.bf16 %v223_v3, %v221_v2  ;;  %v222_v6 = vld [vmem:[%s181_s8 + $0x10] sm:$0xff]  ;;  %v225_v7 = vld [vmem:[%s181_s8 + $0x28] sm:$0xff]  ;;  %p210_p7 = scmp.lt.s32.totalorder %s562_s15, 1 }
  0x35   : > { %v227_v8 = vld [vmem:[%s181_s8 + $0x38] sm:$0xff]  ;;  %v424_v9 = vpack.c.bf16 %v222_v6, %v220_v4  ;;  %v224_v11 = vld [vmem:[%s181_s8 + $0x20] sm:$0xff]  ;;  %v226_v12 = vld [vmem:[%s181_s8 + $0x30] sm:$0xff] }
  0x36   : > { %v426_v10 = vpack.c.bf16 %v227_v8, %v225_v7  ;;  %423 = vmatprep.subr.bf16.mxu0 %v422_v5  ;;  %v228_v13 = vld [vmem:[%s729_s2] sm:$0x3f]  ;;  %v428_v14 = vpack.c.bf16 %v226_v12, %v224_v11  ;;  %s742_s15 = smov (!%p210_p7, %s562_s15), 1 }
  0x37   : > { %425 = vmatpush1.bf16.msra.mxu0 %v424_v9  ;;  %231 = vperm.xlu0 %489, %v228_v13   ;;  %v219_v15 = vld [vmem:[%s728_s1] sm:$0x3f]  ;;  %s421_s7 = sshll.u32 %s742_s15, 4 }
  0x38   : > { %427 = vmatprep.subr.bf16.mxu0 %v426_v10  ;;  %s217_s11 = scalar_lea.vmem %s730_s3, %s421_s7 }
  0x3b   : > { %429 = vmatpush1.bf16.msra.mxu0 %v428_v14 }
  0x3e   : > { %417 = vmatmul.mubr.msk.f32.vlgmr.msra.gmra.mrb[0].mxu0 %vm234_vm0, %v219_v15 }
  0xb6   : > { %v232_v16 = vpop.permute.xlu0 %231 }
 0x111   : > { %v304_v17 = vpop.f32.mrb[0].mxu0 }
 0x112   : > { %v305_v18 = vadd.f32 %v304_v17, %v232_v16  ;;  %v306_v19 = vpop.f32.mrb[1].mxu0 }
 0x113   : > { %v307_v20 = vadd.f32 %v306_v19, %v232_v16 }
 0x114   : > { %309 = vst [vmem:[%s217_s11] sm:$0x3f] %v305_v18 }
 0x115   : > { %310 = vst [vmem:[%s217_s11 + $0x8] sm:$0x3f] %v307_v20 }
 0x116 PF: > { %s16_s17 = sadd.s32 1, %s570_s17   ;;  %s734_s12 = smov %s554_s13 }
 0x117   : > { %p13_p9 = scmp.ge.s32.totalorder %s16_s17, 4   ;;  %s735_s13 = smov %s558_s14 }
 0x118   : > { %s736_s14 = smov %s646_s24  ;;  %s737_s15 = smov %s566_s16 }
 0x119   : > { %s738_s16 = smov %s740_s19  ;;  %15 = sbr.rel (!%p13_p9) target bundleno = 4 (0x4), region = 72 }
 0x120   :  { %341 = vsyncpa [#allocation3], 1 }
 0x121   :  { %343 = vsyncpa [#allocation3 + $0x1], 1 }

</bundles_post_ra>
